<compile_context>
chip_gen: v7x
topology: tpu7x:2x2x1
jax: 0.10.0
libtpu: 0.0.40
codegen_flags: <defaults>
</compile_context>

<pallas_src>
import math

import jax
import jax.numpy as jnp
from jax.experimental import pallas as pl
from jax.experimental.pallas import tpu as pltpu

NEG_SLOPE = 0.01   # nn.LeakyReLU default
LANE = 128


def _leaky_relu(x):
    return jnp.where(x >= 0, x, NEG_SLOPE * x)


def _round_up(n, m):
    return (n + m - 1) // m * m


# ----------------------------------------------------------------------------
# Kernel
# ----------------------------------------------------------------------------
def make_convex_nn_kernel(n_layers, out_dim):
    """Fused kernel: all layers computed on one batch tile held in VMEM.

    Ref layout:
      [x, Wm_0, b_0, ..., Wm_{L-1}, b_{L-1}, Ws_0, ..., Ws_{L-2}, out]
    where Wm_i is |W_i|^T   (shape (in_pad, out_pad), bf16, precomputed),
          Ws_i is Wskip_i^T (shape (in0,   out_pad), bf16, precomputed),
          b_i  is f32 (1, out_pad) with the skip bias already folded in.
    x arrives as bf16 from the wrapper.
    """

    def kernel(*refs):
        x_ref = refs[0]
        main_refs = refs[1:1 + 2 * n_layers]
        skip_refs = refs[1 + 2 * n_layers:1 + 2 * n_layers + (n_layers - 1)]
        out_ref = refs[-1]

        x_bf16 = x_ref[...]                  # bf16 MXU operand (skips + layer 0)
        h_mm = x_bf16                        # current layer's bf16 matmul operand
        h = None
        for i in range(n_layers):
            W = main_refs[2 * i][...]        # (in_pad, out_pad) bf16
            b = main_refs[2 * i + 1][...]    # (1, out_pad) f32, skip-bias folded
            acc = jnp.dot(h_mm, W, preferred_element_type=jnp.float32)
            if i > 0:
                Ws = skip_refs[i - 1][...]   # (in0, out_pad) bf16
                acc = acc + jnp.dot(x_bf16, Ws,
                                    preferred_element_type=jnp.float32)
            h = acc + b                      # f32 bias add
            if i < n_layers - 1:
                h = _leaky_relu(h)           # f32 elementwise
                h_mm = h.astype(jnp.bfloat16)
        # Unpadded final store: only the valid dims[-1] lanes go to HBM.
        out_ref[...] = h[:, :out_dim].astype(out_ref.dtype)

    return kernel


# ----------------------------------------------------------------------------
# Parameter prep (abs, transpose, pad, bias folding, cast) — outside the kernel
# ----------------------------------------------------------------------------
def prepare_params(weights, biases, skip_weights, skip_biases, dims,
                   compute_dtype=jnp.bfloat16):
    n_layers = len(dims) - 1
    # input width stays as-is; every layer *output* width is padded to 128.
    pad_dims = [dims[0]] + [_round_up(d, LANE) for d in dims[1:]]

    Wm, Bm, Ws = [], [], []
    for i in range(n_layers):
        in_p, out_p = pad_dims[i], pad_dims[i + 1]
        W = jnp.abs(weights[i]).T                     # (in, out), abs hoisted
        W = jnp.pad(W, ((0, in_p - W.shape[0]), (0, out_p - W.shape[1])))
        Wm.append(W.astype(compute_dtype))

        b = biases[i]
        if i > 0:
            b = b + skip_biases[i - 1]                # fold skip bias in
            S = skip_weights[i - 1].T                 # (in0, out)
            S = jnp.pad(S, ((0, 0), (0, out_p - S.shape[1])))
            Ws.append(S.astype(compute_dtype))
        b = jnp.pad(b, (0, out_p - b.shape[0]))
        Bm.append(b.reshape(1, -1).astype(jnp.float32))
    return Wm, Bm, Ws, pad_dims


# ----------------------------------------------------------------------------
# Pallas wrapper
# ----------------------------------------------------------------------------
def convex_nn_forward(x, weights, biases, skip_weights, skip_biases, dims, *,
                      block_batch=2048):
    n_layers = len(dims) - 1
    out_dim = dims[-1]
    Wm, Bm, Ws, _ = prepare_params(
        weights, biases, skip_weights, skip_biases, dims)

    B, IN = x.shape
    x_bf16 = x.astype(jnp.bfloat16)           # halve the x HBM read

    # --- batch tile selection -------------------------------------------------
    B_ru = _round_up(B, LANE)
    TB = min(block_batch, B_ru)               # TB is a multiple of 128
    # Prefer >=2 (even) grid steps so both v7x TensorCores get work.
    if B_ru > LANE and B_ru // TB < 2:
        TB = _round_up(B_ru // 2, LANE)
    TB = min(TB, 4096)                        # v5e 16 MiB scoped-VMEM headroom
    B_pad = _round_up(B, TB)
    if B_pad != B:
        x_bf16 = jnp.pad(x_bf16, ((0, B_pad - B), (0, 0)))
    grid = (B_pad // TB,)

    inputs = [x_bf16]
    for W, b in zip(Wm, Bm):
        inputs += [W, b]
    inputs += list(Ws)

    # x tiled over the batch; weights/biases resident (constant block index).
    in_specs = [pl.BlockSpec((TB, IN), lambda i: (i, 0))]
    for arr in inputs[1:]:
        in_specs.append(pl.BlockSpec(arr.shape, lambda i: (0, 0)))
    # Unpadded output block (full-array last dim) -> 8x fewer HBM bytes written.
    out_spec = pl.BlockSpec((TB, out_dim), lambda i: (i, 0))

    kernel = make_convex_nn_kernel(n_layers, out_dim)
    out = pl.pallas_call(
        kernel,
        out_shape=jax.ShapeDtypeStruct((B_pad, out_dim), jnp.float32),
        grid=grid,
        in_specs=in_specs,
        out_specs=out_spec,
        compiler_params=pltpu.CompilerParams(
            dimension_semantics=("parallel",)),
    )(*inputs)

    return out[:B]


# ----------------------------------------------------------------------------
# Init (mimics nn.Linear default init + the *0.1 scaling in ConvexNN.__init__)
# ----------------------------------------------------------------------------
def init_params(key, dims):
    n_layers = len(dims) - 1
    weights, biases, skip_weights, skip_biases = [], [], [], []
    for i in range(n_layers):
        key, k1, k2 = jax.random.split(key, 3)
        bound = 1.0 / math.sqrt(dims[i])
        W = jax.random.uniform(k1, (dims[i + 1], dims[i]),
                               jnp.float32, -bound, bound)
        b = jax.random.uniform(k2, (dims[i + 1],), jnp.float32, -bound, bound)
        if i > 0:
            W = W * 0.1
            key, k3, k4 = jax.random.split(key, 3)
            s_bound = 1.0 / math.sqrt(dims[0])
            Ws = jax.random.uniform(k3, (dims[i + 1], dims[0]),
                                    jnp.float32, -s_bound, s_bound) * 0.1
            bs = jax.random.uniform(k4, (dims[i + 1],),
                                    jnp.float32, -s_bound, s_bound)
            skip_weights.append(Ws)
            skip_biases.append(bs)
        weights.append(W)
        biases.append(b)
    return weights, biases, skip_weights, skip_biases


def convex_nn_reference(x, weights, biases, skip_weights, skip_biases, dims):
    """Pure-JAX f32 reference for correctness checking."""
    n_layers = len(dims) - 1
    h = x
    for i in range(n_layers):
        h = h @ jnp.abs(weights[i]).T + biases[i]
        if i > 0:
            h = h + x @ skip_weights[i - 1].T + skip_biases[i - 1]
        if i < n_layers - 1:
            h = _leaky_relu(h)
    return h


if __name__ == "__main__":
    dims = [32, 64, 64, 16]   # input feat 32, hidden 64, 64, output 16
    batch = 512               # -> TB=256, 2-step grid (both v7x cores active)

    key = jax.random.PRNGKey(0)
    key, kx = jax.random.split(key)
    x = jax.random.normal(kx, (batch, dims[0]), jnp.float32)

    weights, biases, skip_weights, skip_biases = init_params(key, dims)

    out = convex_nn_forward(x, weights, biases, skip_weights, skip_biases,
                            dims, block_batch=2048)
    out = jax.block_until_ready(out)

    ref = convex_nn_reference(x, weights, biases, skip_weights, skip_biases,
                              dims)
    assert out.shape == (batch, dims[-1])
    # bf16 MXU inputs with f32 accumulation -> looser tolerance vs f32 ref.
    assert jnp.allclose(out, ref, atol=3e-2, rtol=3e-2), "mismatch vs reference"

    print("KERNEL_OK")
</pallas_src>

<mosaic_0001>
module attributes {stable_mosaic.version = 11 : i64} {
  func.func @kernel(%arg0: i32, %arg1: memref<256x32xbf16, #tpu.memory_space<vmem>>, %arg2: memref<32x128xbf16, #tpu.memory_space<vmem>>, %arg3: memref<1x128xf32, #tpu.memory_space<vmem>>, %arg4: memref<128x128xbf16, #tpu.memory_space<vmem>>, %arg5: memref<1x128xf32, #tpu.memory_space<vmem>>, %arg6: memref<128x128xbf16, #tpu.memory_space<vmem>>, %arg7: memref<1x128xf32, #tpu.memory_space<vmem>>, %arg8: memref<32x128xbf16, #tpu.memory_space<vmem>>, %arg9: memref<32x128xbf16, #tpu.memory_space<vmem>>, %arg10: memref<256x16xf32, #tpu.memory_space<vmem>>) attributes {dimension_semantics = [#tpu.dimension_semantics<parallel>], iteration_bounds = array<i64: 2>, scalar_prefetch = 0 : i64, scratch_operands = 0 : i64, tpu.core_type = #tpu.core_type<tc>, window_params = [{transform_indices = @transform_0, window_bounds = array<i64: 256, 32>}, {pipeline_mode = #tpu.pipeline_mode<synchronous>, transform_indices = @transform_1, window_bounds = array<i64: 32, 128>}, {pipeline_mode = #tpu.pipeline_mode<synchronous>, transform_indices = @transform_2, window_bounds = array<i64: 1, 128>}, {pipeline_mode = #tpu.pipeline_mode<synchronous>, transform_indices = @transform_3, window_bounds = array<i64: 128, 128>}, {pipeline_mode = #tpu.pipeline_mode<synchronous>, transform_indices = @transform_4, window_bounds = array<i64: 1, 128>}, {pipeline_mode = #tpu.pipeline_mode<synchronous>, transform_indices = @transform_5, window_bounds = array<i64: 128, 128>}, {pipeline_mode = #tpu.pipeline_mode<synchronous>, transform_indices = @transform_6, window_bounds = array<i64: 1, 128>}, {pipeline_mode = #tpu.pipeline_mode<synchronous>, transform_indices = @transform_7, window_bounds = array<i64: 32, 128>}, {pipeline_mode = #tpu.pipeline_mode<synchronous>, transform_indices = @transform_8, window_bounds = array<i64: 32, 128>}, {transform_indices = @transform_9, window_bounds = array<i64: 256, 16>}]} {
    %c0 = arith.constant 0 : index
    %c0_0 = arith.constant 0 : index
    %0 = vector.load %arg1[%c0, %c0_0] : memref<256x32xbf16, #tpu.memory_space<vmem>>, vector<256x32xbf16>
    %c0_1 = arith.constant 0 : index
    %c0_2 = arith.constant 0 : index
    %1 = vector.load %arg2[%c0_1, %c0_2] : memref<32x128xbf16, #tpu.memory_space<vmem>>, vector<32x128xbf16>
    %c0_3 = arith.constant 0 : index
    %c0_4 = arith.constant 0 : index
    %2 = vector.load %arg3[%c0_3, %c0_4] : memref<1x128xf32, #tpu.memory_space<vmem>>, vector<1x128xf32>
    %cst = arith.constant dense<0.000000e+00> : vector<256x128xf32>
    %3 = tpu.matmul %0, %1, %cst {dimension_numbers = #tpu.dot_dimension_numbers<[1], [0], [0], [1], [0, 0, 1, 1], [], []>} : vector<256x32xbf16>, vector<32x128xbf16>, vector<256x128xf32> -> vector<256x128xf32>
    %4 = vector.broadcast %2 : vector<1x128xf32> to vector<256x128xf32>
    %5 = arith.addf %3, %4 : vector<256x128xf32>
    %cst_5 = arith.constant 0.000000e+00 : f32
    %6 = vector.broadcast %cst_5 : f32 to vector<256x128xf32>
    %7 = arith.cmpf oge, %5, %6 : vector<256x128xf32>
    %cst_6 = arith.constant 0.00999999977 : f32
    %8 = vector.broadcast %cst_6 : f32 to vector<256x128xf32>
    %9 = arith.mulf %8, %5 : vector<256x128xf32>
    %10 = arith.select %7, %5, %9 : vector<256x128xi1>, vector<256x128xf32>
    %11 = arith.truncf %10 : vector<256x128xf32> to vector<256x128xbf16>
    %c0_7 = arith.constant 0 : index
    %c0_8 = arith.constant 0 : index
    %12 = vector.load %arg4[%c0_7, %c0_8] : memref<128x128xbf16, #tpu.memory_space<vmem>>, vector<128x128xbf16>
    %c0_9 = arith.constant 0 : index
    %c0_10 = arith.constant 0 : index
    %13 = vector.load %arg5[%c0_9, %c0_10] : memref<1x128xf32, #tpu.memory_space<vmem>>, vector<1x128xf32>
    %cst_11 = arith.constant dense<0.000000e+00> : vector<256x128xf32>
    %14 = tpu.matmul %11, %12, %cst_11 {dimension_numbers = #tpu.dot_dimension_numbers<[1], [0], [0], [1], [0, 0, 1, 1], [], []>} : vector<256x128xbf16>, vector<128x128xbf16>, vector<256x128xf32> -> vector<256x128xf32>
    %c0_12 = arith.constant 0 : index
    %c0_13 = arith.constant 0 : index
    %15 = vector.load %arg8[%c0_12, %c0_13] : memref<32x128xbf16, #tpu.memory_space<vmem>>, vector<32x128xbf16>
    %cst_14 = arith.constant dense<0.000000e+00> : vector<256x128xf32>
    %16 = tpu.matmul %0, %15, %cst_14 {dimension_numbers = #tpu.dot_dimension_numbers<[1], [0], [0], [1], [0, 0, 1, 1], [], []>} : vector<256x32xbf16>, vector<32x128xbf16>, vector<256x128xf32> -> vector<256x128xf32>
    %17 = arith.addf %14, %16 : vector<256x128xf32>
    %18 = vector.broadcast %13 : vector<1x128xf32> to vector<256x128xf32>
    %19 = arith.addf %17, %18 : vector<256x128xf32>
    %cst_15 = arith.constant 0.000000e+00 : f32
    %20 = vector.broadcast %cst_15 : f32 to vector<256x128xf32>
    %21 = arith.cmpf oge, %19, %20 : vector<256x128xf32>
    %cst_16 = arith.constant 0.00999999977 : f32
    %22 = vector.broadcast %cst_16 : f32 to vector<256x128xf32>
    %23 = arith.mulf %22, %19 : vector<256x128xf32>
    %24 = arith.select %21, %19, %23 : vector<256x128xi1>, vector<256x128xf32>
    %25 = arith.truncf %24 : vector<256x128xf32> to vector<256x128xbf16>
    %c0_17 = arith.constant 0 : index
    %c0_18 = arith.constant 0 : index
    %26 = vector.load %arg6[%c0_17, %c0_18] : memref<128x128xbf16, #tpu.memory_space<vmem>>, vector<128x128xbf16>
    %c0_19 = arith.constant 0 : index
    %c0_20 = arith.constant 0 : index
    %27 = vector.load %arg7[%c0_19, %c0_20] : memref<1x128xf32, #tpu.memory_space<vmem>>, vector<1x128xf32>
    %cst_21 = arith.constant dense<0.000000e+00> : vector<256x128xf32>
    %28 = tpu.matmul %25, %26, %cst_21 {dimension_numbers = #tpu.dot_dimension_numbers<[1], [0], [0], [1], [0, 0, 1, 1], [], []>} : vector<256x128xbf16>, vector<128x128xbf16>, vector<256x128xf32> -> vector<256x128xf32>
    %c0_22 = arith.constant 0 : index
    %c0_23 = arith.constant 0 : index
    %29 = vector.load %arg9[%c0_22, %c0_23] : memref<32x128xbf16, #tpu.memory_space<vmem>>, vector<32x128xbf16>
    %cst_24 = arith.constant dense<0.000000e+00> : vector<256x128xf32>
    %30 = tpu.matmul %0, %29, %cst_24 {dimension_numbers = #tpu.dot_dimension_numbers<[1], [0], [0], [1], [0, 0, 1, 1], [], []>} : vector<256x32xbf16>, vector<32x128xbf16>, vector<256x128xf32> -> vector<256x128xf32>
    %31 = arith.addf %28, %30 : vector<256x128xf32>
    %32 = vector.broadcast %27 : vector<1x128xf32> to vector<256x128xf32>
    %33 = arith.addf %31, %32 : vector<256x128xf32>
    %34 = vector.extract_strided_slice %33 {offsets = [0, 0], sizes = [256, 16], strides = [1, 1]} : vector<256x128xf32> to vector<256x16xf32>
    %c0_25 = arith.constant 0 : index
    %c0_26 = arith.constant 0 : index
    %35 = vector.load %arg10[%c0_25, %c0_26] : memref<256x16xf32, #tpu.memory_space<vmem>>, vector<256x16xf32>
    tpu.vector_store %arg10[%c0_25, %c0_26], %34 {strides = array<i32>} : memref<256x16xf32, #tpu.memory_space<vmem>>, vector<256x16xf32>,
    return
  }
  func.func @transform_0(%arg0: i32) -> (i32, i32) {
    %c0_i32 = arith.constant 0 : i32
    %c0_i32_0 = arith.constant 0 : i32
    return %arg0, %c0_i32 : i32, i32
  }
  func.func @transform_1(%arg0: i32) -> (i32, i32) {
    %c0_i32 = arith.constant 0 : i32
    %c0_i32_0 = arith.constant 0 : i32
    %c0_i32_1 = arith.constant 0 : i32
    return %c0_i32, %c0_i32_0 : i32, i32
  }
  func.func @transform_2(%arg0: i32) -> (i32, i32) {
    %c0_i32 = arith.constant 0 : i32
    %c0_i32_0 = arith.constant 0 : i32
    %c0_i32_1 = arith.constant 0 : i32
    return %c0_i32, %c0_i32_0 : i32, i32
  }
  func.func @transform_3(%arg0: i32) -> (i32, i32) {
    %c0_i32 = arith.constant 0 : i32
    %c0_i32_0 = arith.constant 0 : i32
    %c0_i32_1 = arith.constant 0 : i32
    return %c0_i32, %c0_i32_0 : i32, i32
  }
  func.func @transform_4(%arg0: i32) -> (i32, i32) {
    %c0_i32 = arith.constant 0 : i32
    %c0_i32_0 = arith.constant 0 : i32
    %c0_i32_1 = arith.constant 0 : i32
    return %c0_i32, %c0_i32_0 : i32, i32
  }
  func.func @transform_5(%arg0: i32) -> (i32, i32) {
    %c0_i32 = arith.constant 0 : i32
    %c0_i32_0 = arith.constant 0 : i32
    %c0_i32_1 = arith.constant 0 : i32
    return %c0_i32, %c0_i32_0 : i32, i32
  }
  func.func @transform_6(%arg0: i32) -> (i32, i32) {
    %c0_i32 = arith.constant 0 : i32
    %c0_i32_0 = arith.constant 0 : i32
    %c0_i32_1 = arith.constant 0 : i32
    return %c0_i32, %c0_i32_0 : i32, i32
  }
  func.func @transform_7(%arg0: i32) -> (i32, i32) {
    %c0_i32 = arith.constant 0 : i32
    %c0_i32_0 = arith.constant 0 : i32
    %c0_i32_1 = arith.constant 0 : i32
    return %c0_i32, %c0_i32_0 : i32, i32
  }
  func.func @transform_8(%arg0: i32) -> (i32, i32) {
    %c0_i32 = arith.constant 0 : i32
    %c0_i32_0 = arith.constant 0 : i32
    %c0_i32_1 = arith.constant 0 : i32
    return %c0_i32, %c0_i32_0 : i32, i32
  }
  func.func @transform_9(%arg0: i32) -> (i32, i32) {
    %c0_i32 = arith.constant 0 : i32
    %c0_i32_0 = arith.constant 0 : i32
    return %arg0, %c0_i32 : i32, i32
  }
}

</mosaic_0001>

<bundles_post_ra>
// kernel: tpu_custom_call.1
= control target key start
LH: loop header
LB: loop body
LE: loop exit
PB: predicated region body
PF: predicated region fallthrough
CT: control target
= control target key end

     0   :  { %s2455_s30 = smov 0   ;;  %s2905_s0 = inlined_call_operand.vmem [shape: bf16[512,32], index: 0, kind: input, shape index: {}]   ;;  %s2906_s1 = inlined_call_operand.vmem [shape: bf16[32,128], index: 1, kind: input, shape index: {}]   ;;  %s2907_s2 = inlined_call_operand.vmem [shape: f32[1,128], index: 2, kind: input, shape index: {}]   ;;  %s2908_s3 = inlined_call_operand.vmem [shape: bf16[128,128], index: 3, kind: input, shape index: {}]   ;;  %s2909_s4 = inlined_call_operand.vmem [shape: f32[1,128], index: 4, kind: input, shape index: {}]   ;;  %s2910_s5 = inlined_call_operand.vmem [shape: bf16[128,128], index: 5, kind: input, shape index: {}]   ;;  %s2911_s6 = inlined_call_operand.vmem [shape: f32[1,128], index: 6, kind: input, shape index: {}]   ;;  %s2912_s7 = inlined_call_operand.vmem [shape: bf16[32,128], index: 7, kind: input, shape index: {}]   ;;  %s2913_s8 = inlined_call_operand.vmem [shape: bf16[32,128], index: 8, kind: input, shape index: {}]   ;;  %s2914_s9 = inlined_call_operand.vmem [shape: f32[512,16], index: 9, kind: output, shape index: {}]  }
   0x1 LB: > { %s1877_s10 = sadd.s32 4294967295, %s2403_s30   ;;  %p1881_p0 = scmp.ge.s32.totalorder %s2403_s30, 1  ;;  %s2403_s30 = sphi %s2455_s30, %s19_s30  }
   0x2   : > { %p288_p1 = scmp.lt.s32.totalorder %s2403_s30, 3 }
   0x4   : > { %p289_p2 = pnand %p1881_p0, %p288_p1 }
   0x5   : > { %v2359_v0 = vld [vmem:[%s2906_s1] sm:$0xff] (!%p289_p2)   ;;  %s1882_s13 = sshll.u32 (!%p289_p2), %s1877_s10, 5  ;;  %v2360_v1 = vld [vmem:[%s2906_s1 + $0x8] sm:$0xff] (!%p289_p2)   ;;  %vm472_vm0 = vcmask (!%p289_p2), 261120   ;;  %v2381_v22 = vld [vmem:[%s2908_s3 + $0x10] sm:$0xff] (!%p289_p2)  }
   0x6   : > { %292 = sbr.rel (%p289_p2) target bundleno = 738 (0x2e2), region = 56  ;;  %p325_p3 = scmp.lt.s32.totalorder (!%p289_p2), %s1882_s13, 63  ;;  %2079 = vmatprep.subr.bf16.mxu0 (!%p289_p2), %v2359_v0  ;;  %2283 = vmatprep.subr.bf16.mxu1 (!%p289_p2), %v2359_v0  ;;  %v2377_v2 = vld [vmem:[%s2912_s7] sm:$0xff] (!%p289_p2)   ;;  %v2378_v9 = vld [vmem:[%s2912_s7 + $0x8] sm:$0xff] (!%p289_p2)   ;;  %v2382_v23 = vld [vmem:[%s2908_s3 + $0x18] sm:$0xff] (!%p289_p2)  }
   0x7   : > { %2080 = vmatpush3.bf16.msra.mxu0 (!%p289_p2), %v2359_v0  ;;  %2285 = vmatpush3.bf16.msra.mxu1 (!%p289_p2), %v2359_v0  ;;  %v2379_v12 = vld [vmem:[%s2908_s3] sm:$0xff] (!%p289_p2)   ;;  %v2380_v21 = vld [vmem:[%s2908_s3 + $0x8] sm:$0xff] (!%p289_p2)   ;;  %v2385_v26 = vld [vmem:[%s2908_s3 + $0x30] sm:$0xff] (!%p289_p2)  }
   0x8   : > { %2081 = vmatprep.subr.bf16.mxu0 (!%p289_p2), %v2360_v1  ;;  %2284 = vmatprep.subr.bf16.mxu1 (!%p289_p2), %v2360_v1  ;;  %v2383_v24 = vld [vmem:[%s2908_s3 + $0x20] sm:$0xff] (!%p289_p2)   ;;  %v2384_v25 = vld [vmem:[%s2908_s3 + $0x28] sm:$0xff] (!%p289_p2)   ;;  %v2386_v27 = vld [vmem:[%s2908_s3 + $0x38] sm:$0xff] (!%p289_p2)  }
   0x9   : > { %v2387_v28 = vld [vmem:[%s2913_s8] sm:$0xff] (!%p289_p2)   ;;  %v2388_v29 = vld [vmem:[%s2913_s8 + $0x8] sm:$0xff] (!%p289_p2)   ;;  %v2391_v32 = vld [vmem:[%s2910_s5 + $0x10] sm:$0xff] (!%p289_p2)  }
   0xa   : > { %v2389_v30 = vld [vmem:[%s2910_s5] sm:$0xff] (!%p289_p2)   ;;  %v2390_v31 = vld [vmem:[%s2910_s5 + $0x8] sm:$0xff] (!%p289_p2)   ;;  %v2392_v33 = vld [vmem:[%s2910_s5 + $0x18] sm:$0xff] (!%p289_p2)  }
   0xb   : > { %2082 = vmatpush3.bf16.msra.mxu0 (!%p289_p2), %v2360_v1  ;;  %2286 = vmatpush3.bf16.msra.mxu1 (!%p289_p2), %v2360_v1  ;;  %v2393_v34 = vld [vmem:[%s2910_s5 + $0x20] sm:$0xff] (!%p289_p2)   ;;  %v2394_v35 = vld [vmem:[%s2910_s5 + $0x28] sm:$0xff] (!%p289_p2)   ;;  %v2395_v36 = vld [vmem:[%s2910_s5 + $0x30] sm:$0xff] (!%p289_p2)  }
   0xc   : > { %2115 = vmatprep.subr.bf16.mxu1 (!%p289_p2), %v2377_v2  ;;  %2199 = vmatprep.subr.bf16.mxu0 (!%p289_p2), %v2387_v28  ;;  %v2670_v37 = vld [vmem:[%s2907_s2] ss:$0 sm:$0xff] (!%p289_p2) }
   0xd   : > { %s2916_s13 = smov (!%p325_p3, %s1882_s13), 63 }
   0xe   : > { %s1883_s18 = sshll.u32 %s2916_s13, 2  ;;  %s1885_s26 = sshll.u32 %s2916_s13, 3 }
   0xf   : > { %s2478_s21 = scalar_lea.vmem %s2905_s0, %s1883_s18  ;;  %s2804_s11 = scalar_lea.vmem %s2914_s9, %s1885_s26 }
  0x10   : > { %v2361_v3 = vld [vmem:[%s2478_s21] sm:$0xff]   ;;  %v2482_v4 = vld [vmem:[%s2478_s21 + $0x8] sm:$0xff]   ;;  %v2486_v5 = vld [vmem:[%s2478_s21 + $0x10] sm:$0xff]  }
  0x11   : > { %2083 = vmatprep.mubr.msk.bf16.mxu0 %vm472_vm0, %v2361_v3  ;;  %v2493_v6 = vld [vmem:[%s2478_s21 + $0x18] sm:$0xff]   ;;  %v2496_v7 = vld [vmem:[%s2478_s21 + $0x20] sm:$0xff]   ;;  %v2505_v10 = vld [vmem:[%s2478_s21 + $0x48] sm:$0xff]  }
  0x12   : > { %2084 = vmatmul.mubr.msk.bf16.vlgmr.msra.gmra.mrb[0].mxu0 %vm472_vm0, %v2482_v4  ;;  %v2499_v8 = vld [vmem:[%s2478_s21 + $0x40] sm:$0xff]   ;;  %v2510_v11 = vld [vmem:[%s2478_s21 + $0x50] sm:$0xff]   ;;  %v2524_v13 = vld [vmem:[%s2478_s21 + $0x28] sm:$0xff]  }
  0x13   : > { %2087 = vmatprep.mubr.msk.bf16.mxu0 %vm472_vm0, %v2486_v5  ;;  %2099 = vmatprep.mubr.msk.bf16.mxu1 %vm472_vm0, %v2499_v8  ;;  %v2527_v14 = vld [vmem:[%s2478_s21 + $0x30] sm:$0xff]   ;;  %v2530_v15 = vld [vmem:[%s2478_s21 + $0x58] sm:$0xff]   ;;  %v2533_v16 = vld [vmem:[%s2478_s21 + $0x60] sm:$0xff]  }
  0x14   : > { %2100 = vmatmul.mubr.msk.bf16.vlgmr.msra.gmra.mrb[0].mxu1 %vm472_vm0, %v2505_v10  ;;  %v2544_v17 = vld [vmem:[%s2478_s21 + $0x38] sm:$0xff]   ;;  %v2547_v18 = vld [vmem:[%s2478_s21 + $0x68] sm:$0xff]   ;;  %v2550_v19 = vld [vmem:[%s2478_s21 + $0x70] sm:$0xff]   ;;  %2200 = vmatpush3.bf16.msra.mxu0 %v2387_v28 }
  0x15   : > { %2103 = vmatprep.mubr.msk.bf16.mxu1 %vm472_vm0, %v2510_v11  ;;  %2116 = vmatpush3.bf16.msra.mxu1 %v2377_v2  ;;  %v2560_v20 = vld [vmem:[%s2478_s21 + $0x78] sm:$0xff]  }
  0x16   : > { %2117 = vmatprep.subr.bf16.mxu1 %v2378_v9  ;;  %2201 = vmatprep.subr.bf16.mxu0 %v2388_v29 }
  0x18   : > { %2202 = vmatpush3.bf16.msra.mxu0 %v2388_v29 }
  0x19   : > { %2118 = vmatpush3.bf16.msra.mxu1 %v2378_v9  ;;  %2235 = vmatprep.subr.bf16.mxu0 %v2389_v30 }
  0x1a   : > { %2088 = vmatmul.mubr.msk.bf16.gmra.mrb[4].mxu0 %vm472_vm0, %v2493_v6  ;;  %2151 = vmatprep.subr.bf16.mxu1 %v2379_v12 }
  0x1b   : > { %2091 = vmatprep.mubr.msk.bf16.mxu0 %vm472_vm0, %v2496_v7 }
  0x1c   : > { %2104 = vmatmul.mubr.msk.bf16.gmra.mrb[4].mxu1 %vm472_vm0, %v2530_v15 }
  0x1d   : > { %2107 = vmatprep.mubr.msk.bf16.mxu1 %vm472_vm0, %v2533_v16 }
  0x22   : > { %2092 = vmatmul.mubr.msk.bf16.gmra.mrb[8].mxu0 %vm472_vm0, %v2524_v13 }
  0x23   : > { %2095 = vmatprep.mubr.msk.bf16.mxu0 %vm472_vm0, %v2527_v14 }
  0x24   : > { %2108 = vmatmul.mubr.msk.bf16.gmra.mrb[8].mxu1 %vm472_vm0, %v2547_v18 }
  0x25   : > { %2111 = vmatprep.mubr.msk.bf16.mxu1 %vm472_vm0, %v2550_v19 }
  0x2a   : > { %2096 = vmatmul.mubr.msk.bf16.gmra.mrb[12].mxu0 %vm472_vm0, %v2544_v17 }
  0x2b   : > { %2203 = vmatprep.mubr.msk.bf16.mxu0 %vm472_vm0, %v2361_v3 }
  0x2c   : > { %2112 = vmatmul.mubr.msk.bf16.gmra.mrb[12].mxu1 %vm472_vm0, %v2560_v20 }
  0x2d   : > { %2119 = vmatprep.mubr.msk.bf16.mxu1 %vm472_vm0, %v2361_v3 }
  0x32   : > { %2204 = vmatmul.mubr.msk.bf16.vlgmr.msra.gmra.mrb[16].mxu0 %vm472_vm0, %v2482_v4 }
  0x33   : > { %2236 = vmatpush3.bf16.msra.mxu0 %v2389_v30  ;;  %2207 = vmatprep.mubr.msk.bf16.mxu0 %vm472_vm0, %v2486_v5 }
  0x34   : > { %2120 = vmatmul.mubr.msk.bf16.vlgmr.msra.gmra.mrb[16].mxu1 %vm472_vm0, %v2482_v4  ;;  %2237 = vmatprep.subr.bf16.mxu0 %v2390_v31 }
  0x35   : > { %2152 = vmatpush3.bf16.msra.mxu1 %v2379_v12  ;;  %2123 = vmatprep.mubr.msk.bf16.mxu1 %vm472_vm0, %v2486_v5 }
  0x36   : > { %2153 = vmatprep.subr.bf16.mxu1 %v2380_v21 }
  0x37   : > { %2238 = vmatpush3.bf16.msra.mxu0 %v2390_v31 }
  0x38   : > { %2239 = vmatprep.subr.bf16.mxu0 %v2391_v32 }
  0x39   : > { %2154 = vmatpush3.bf16.msra.mxu1 %v2380_v21 }
  0x3a   : > { %2155 = vmatprep.subr.bf16.mxu1 %v2381_v22  ;;  %2208 = vmatmul.mubr.msk.bf16.gmra.mrb[20].mxu0 %vm472_vm0, %v2493_v6 }
  0x3b   : > { %2211 = vmatprep.mubr.msk.bf16.mxu0 %vm472_vm0, %v2496_v7  ;;  %2240 = vmatpush3.bf16.msra.mxu0 %v2391_v32 }
  0x3c   : > { %2124 = vmatmul.mubr.msk.bf16.gmra.mrb[20].mxu1 %vm472_vm0, %v2493_v6  ;;  %2241 = vmatprep.subr.bf16.mxu0 %v2392_v33 }
  0x3d   : > { %2127 = vmatprep.mubr.msk.bf16.mxu1 %vm472_vm0, %v2496_v7  ;;  %2156 = vmatpush3.bf16.msra.mxu1 %v2381_v22 }
  0x3e   : > { %2157 = vmatprep.subr.bf16.mxu1 %v2382_v23 }
  0x3f   : > { %2242 = vmatpush3.bf16.msra.mxu0 %v2392_v33 }
  0x40   : > { %2243 = vmatprep.subr.bf16.mxu0 %v2393_v34 }
  0x41   : > { %2158 = vmatpush3.bf16.msra.mxu1 %v2382_v23 }
  0x42   : > { %2159 = vmatprep.subr.bf16.mxu1 %v2383_v24  ;;  %2212 = vmatmul.mubr.msk.bf16.gmra.mrb[24].mxu0 %vm472_vm0, %v2524_v13 }
  0x43   : > { %2215 = vmatprep.mubr.msk.bf16.mxu0 %vm472_vm0, %v2527_v14  ;;  %2244 = vmatpush3.bf16.msra.mxu0 %v2393_v34 }
  0x44   : > { %2128 = vmatmul.mubr.msk.bf16.gmra.mrb[24].mxu1 %vm472_vm0, %v2524_v13  ;;  %2245 = vmatprep.subr.bf16.mxu0 %v2394_v35 }
  0x45   : > { %2131 = vmatprep.mubr.msk.bf16.mxu1 %vm472_vm0, %v2527_v14  ;;  %2160 = vmatpush3.bf16.msra.mxu1 %v2383_v24 }
  0x46   : > { %2161 = vmatprep.subr.bf16.mxu1 %v2384_v25 }
  0x47   : > { %2246 = vmatpush3.bf16.msra.mxu0 %v2394_v35 }
  0x48   : > { %2247 = vmatprep.subr.bf16.mxu0 %v2395_v36 }
  0x49   : > { %2162 = vmatpush3.bf16.msra.mxu1 %v2384_v25 }
  0x4a   : > { %2163 = vmatprep.subr.bf16.mxu1 %v2385_v26  ;;  %2216 = vmatmul.mubr.msk.bf16.gmra.mrb[28].mxu0 %vm472_vm0, %v2544_v17 }
  0x4b   : > { %2219 = vmatprep.mubr.msk.bf16.mxu0 %vm472_vm0, %v2499_v8  ;;  %2248 = vmatpush3.bf16.msra.mxu0 %v2395_v36 }
  0x4c   : > { %2132 = vmatmul.mubr.msk.bf16.gmra.mrb[28].mxu1 %vm472_vm0, %v2544_v17 }
  0x4d   : > { %2135 = vmatprep.mubr.msk.bf16.mxu1 %vm472_vm0, %v2499_v8  ;;  %2164 = vmatpush3.bf16.msra.mxu1 %v2385_v26 }
  0x4e   : > { %2165 = vmatprep.subr.bf16.mxu1 %v2386_v27 }
  0x51   : > { %2166 = vmatpush3.bf16.msra.mxu1 %v2386_v27 }
  0x52   : > { %2220 = vmatmul.mubr.msk.bf16.gmra.mrb[32].mxu0 %vm472_vm0, %v2505_v10 }
  0x53   : > { %2223 = vmatprep.mubr.msk.bf16.mxu0 %vm472_vm0, %v2510_v11 }
  0x54   : > { %2136 = vmatmul.mubr.msk.bf16.gmra.mrb[32].mxu1 %vm472_vm0, %v2505_v10 }
  0x55   : > { %2139 = vmatprep.mubr.msk.bf16.mxu1 %vm472_vm0, %v2510_v11 }
  0x5a   : > { %2224 = vmatmul.mubr.msk.bf16.gmra.mrb[36].mxu0 %vm472_vm0, %v2530_v15 }
  0x5b   : > { %2227 = vmatprep.mubr.msk.bf16.mxu0 %vm472_vm0, %v2533_v16 }
  0x5c   : > { %2140 = vmatmul.mubr.msk.bf16.gmra.mrb[36].mxu1 %vm472_vm0, %v2530_v15 }
  0x5d   : > { %2143 = vmatprep.mubr.msk.bf16.mxu1 %vm472_vm0, %v2533_v16 }
  0x62   : > { %2228 = vmatmul.mubr.msk.bf16.gmra.mrb[40].mxu0 %vm472_vm0, %v2547_v18 }
  0x63   : > { %2231 = vmatprep.mubr.msk.bf16.mxu0 %vm472_vm0, %v2550_v19 }
  0x64   : > { %2144 = vmatmul.mubr.msk.bf16.gmra.mrb[40].mxu1 %vm472_vm0, %v2547_v18 }
  0x65   : > { %2147 = vmatprep.mubr.msk.bf16.mxu1 %vm472_vm0, %v2550_v19 }
  0x6a   : > { %2232 = vmatmul.mubr.msk.bf16.gmra.mrb[44].mxu0 %vm472_vm0, %v2560_v20 }
  0x6c   : > { %2148 = vmatmul.mubr.msk.bf16.gmra.mrb[44].mxu1 %vm472_vm0, %v2560_v20 }
  0xe5   : > { %v2085_v38 = vpop.f32.mrb[0].mxu0 }
  0xe6   : > { %v564_v39 = vadd.f32 %v2085_v38, %v2670_v37  ;;  %v555_v40 = vpop.f32.mrb[1].mxu0 }
  0xe7   : > { %v556_v41 = vadd.f32 %v2670_v37, %v555_v40  ;;  %v2086_v42 = vpop.f32.mrb[2].mxu0  ;;  %v2101_v56 = vpop.f32.mrb[0].mxu1 }
  0xe8   : > { %v716_v43 = vmul.f32 0.01, %v564_v39  ;;  %v567_v44 = vadd.f32 %v2086_v42, %v2670_v37  ;;  %v558_v45 = vpop.f32.mrb[3].mxu0  ;;  %vm684_vm1 = vcmp.ge.f32.partialorder %v564_v39, 0.0  ;;  %v628_v60 = vadd.f32 %v2101_v56, %v2670_v37  ;;  %v619_v61 = vpop.f32.mrb[1].mxu1 }
  0xe9   : > { %v714_v46 = vmul.f32 0.01, %v556_v41  ;;  %v559_v47 = vadd.f32 %v2670_v37, %v558_v45  ;;  %vm682_vm2 = vcmp.ge.f32.partialorder %v556_v41, 0.0  ;;  %v620_v0 = vadd.f32 %v2670_v37, %v619_v61  ;;  %v2102_v1 = vpop.f32.mrb[2].mxu1 }
  0xea   : > { %vm685_vm3 = vcmp.ge.f32.partialorder %v567_v44, 0.0  ;;  %v717_v48 = vmul.f32 0.01, %v567_v44  ;;  %v748_v50 = vsel %vm684_vm1, %v564_v39, %v716_v43  ;;  %v622_v5 = vpop.f32.mrb[3].mxu1  ;;  %v732_v8 = vmul.f32 0.01, %v628_v60 }
  0xeb   : > { %vm683_vm4 = vcmp.ge.f32.partialorder %v559_v47, 0.0  ;;  %v715_v49 = vmul.f32 0.01, %v559_v47  ;;  %v746_v54 = vsel %vm682_vm2, %v556_v41, %v714_v46  ;;  %vm700_vm8 = vcmp.ge.f32.partialorder %v628_v60, 0.0 }
  0xec   : > { %v749_v51 = vsel %vm685_vm3, %v567_v44, %v717_v48  ;;  %vm698_vm10 = vcmp.ge.f32.partialorder %v620_v0, 0.0  ;;  %v730_v11 = vmul.f32 0.01, %v620_v0  ;;  %v631_v14 = vadd.f32 %v2102_v1, %v2670_v37 }
  0xed   : > { %v779_v52 = vpack.c.bf16 %v749_v51, %v748_v50  ;;  %v2089_v53 = vpop.f32.mrb[4].mxu0  ;;  %v747_v55 = vsel %vm683_vm4, %v559_v47, %v715_v49  ;;  %v623_v15 = vadd.f32 %v2670_v37, %v622_v5  ;;  %v2690_v21 = vsel %vm700_vm8, %v628_v60, %v732_v8 }
  0xee   : > { %v580_v57 = vadd.f32 %v2089_v53, %v2670_v37  ;;  %v571_v58 = vpop.f32.mrb[5].mxu0  ;;  %v778_v59 = vpack.c.bf16 %v747_v55, %v746_v54  ;;  %vm701_vm11 = vcmp.ge.f32.partialorder %v631_v14, 0.0  ;;  %v2694_v26 = vsel %vm698_vm10, %v620_v0, %v730_v11 }
  0xef   : > { %v572_v62 = vadd.f32 %v2670_v37, %v571_v58  ;;  %v2090_v63 = vpop.f32.mrb[6].mxu0  ;;  %v2105_v20 = vpop.f32.mrb[4].mxu1  ;;  %v733_v29 = vmul.f32 0.01, %v631_v14  ;;  %vm699_vm12 = vcmp.ge.f32.partialorder %v623_v15, 0.0 }
  0xf0   : > { %v720_v2 = vmul.f32 0.01, %v580_v57  ;;  %v583_v3 = vadd.f32 %v2090_v63, %v2670_v37  ;;  %v574_v4 = vpop.f32.mrb[7].mxu0  ;;  %2167 = vmatprep.mubr.bf16.mxu1 %v778_v59  ;;  %vm688_vm5 = vcmp.ge.f32.partialorder %v580_v57, 0.0  ;;  %v635_v25 = vpop.f32.mrb[5].mxu1  ;;  %v2698_v30 = vadd.f32 %v2105_v20, %v2670_v37 }
  0xf1   : > { %v718_v6 = vmul.f32 0.01, %v572_v62  ;;  %v575_v7 = vadd.f32 %v2670_v37, %v574_v4  ;;  %2168 = vmatmul.mubr.bf16.vlgmr.msra.gmra.mrb[16].mxu1 %v779_v52  ;;  %vm686_vm6 = vcmp.ge.f32.partialorder %v572_v62, 0.0  ;;  %v2106_v31 = vpop.f32.mrb[6].mxu1  ;;  %v2702_v35 = vadd.f32 %v2670_v37, %v635_v25 }
  0xf2   : > { %vm689_vm7 = vcmp.ge.f32.partialorder %v583_v3, 0.0  ;;  %v721_v9 = vmul.f32 0.01, %v583_v3  ;;  %v752_v12 = vsel %vm688_vm5, %v580_v57, %v720_v2  ;;  %v638_v36 = vpop.f32.mrb[7].mxu1  ;;  %v731_v40 = vmul.f32 0.01, %v623_v15 }
  0xf3   : > { %vm687_vm9 = vcmp.ge.f32.partialorder %v575_v7, 0.0  ;;  %v719_v10 = vmul.f32 0.01, %v575_v7  ;;  %v750_v17 = vsel %vm686_vm6, %v572_v62, %v718_v6  ;;  %v2706_v43 = vmul.f32 0.01, %v2698_v30 }
  0xf4   : > { %v753_v13 = vsel %vm689_vm7, %v583_v3, %v721_v9  ;;  %vm702_vm1 = vcmp.ge.f32.partialorder %v2702_v35, 0.0  ;;  %v734_v47 = vmul.f32 0.01, %v2702_v35  ;;  %v2711_v48 = vadd.f32 %v2106_v31, %v2670_v37 }
  0xf5   : > { %v2093_v16 = vpop.f32.mrb[8].mxu0  ;;  %v751_v18 = vsel %vm687_vm9, %v575_v7, %v719_v10  ;;  %v781_v19 = vpack.c.bf16 %v753_v13, %v752_v12  ;;  %v639_v49 = vadd.f32 %v2670_v37, %v638_v36  ;;  %v2715_v53 = vsel %vm699_vm12, %v623_v15, %v731_v40 }
  0xf6   : > { %v596_v22 = vadd.f32 %v2093_v16, %v2670_v37  ;;  %v587_v23 = vpop.f32.mrb[9].mxu0  ;;  %v780_v24 = vpack.c.bf16 %v751_v18, %v750_v17  ;;  %v2718_v55 = vsel %vm701_vm11, %v631_v14, %v733_v29  ;;  %vm704_vm2 = vcmp.ge.f32.partialorder %v2698_v30, 0.0 }
  0xf7   : > { %v588_v27 = vadd.f32 %v2670_v37, %v587_v23  ;;  %v2094_v28 = vpop.f32.mrb[10].mxu0  ;;  %v2109_v54 = vpop.f32.mrb[8].mxu1  ;;  %vm705_vm3 = vcmp.ge.f32.partialorder %v2711_v48, 0.0  ;;  %v737_v59 = vmul.f32 0.01, %v2711_v48  ;;  %vm703_vm4 = vcmp.ge.f32.partialorder %v639_v49, 0.0 }
  0xf8   : > { %vm692_vm13 = vcmp.ge.f32.partialorder %v596_v22, 0.0  ;;  %v724_v32 = vmul.f32 0.01, %v596_v22  ;;  %v599_v33 = vadd.f32 %v2094_v28, %v2670_v37  ;;  %v590_v34 = vpop.f32.mrb[11].mxu0  ;;  %2171 = vmatprep.mubr.bf16.mxu1 %v780_v24  ;;  %v651_v60 = vpop.f32.mrb[9].mxu1  ;;  %v786_v0 = vpack.c.bf16 %v2715_v53, %v2694_v26 }
  0xf9   : > { %vm690_vm14 = vcmp.ge.f32.partialorder %v588_v27, 0.0  ;;  %v722_v38 = vmul.f32 0.01, %v588_v27  ;;  %v591_v39 = vadd.f32 %v2670_v37, %v590_v34  ;;  %2172 = vmatmul.mubr.bf16.gmra.mrb[20].mxu1 %v781_v19  ;;  %v735_v63 = vmul.f32 0.01, %v639_v49  ;;  %v2110_v1 = vpop.f32.mrb[10].mxu1 }
  0xfa   : > { %vm693_vm15 = vcmp.ge.f32.partialorder %v599_v33, 0.0  ;;  %v725_v41 = vmul.f32 0.01, %v599_v33  ;;  %v756_v42 = vsel %vm692_vm13, %v596_v22, %v724_v32  ;;  %v660_v5 = vadd.f32 %v2109_v54, %v2670_v37  ;;  %v654_v6 = vpop.f32.mrb[11].mxu1 }
  0xfb   : > { %vm691_vm0 = vcmp.ge.f32.partialorder %v591_v39, 0.0  ;;  %v723_v44 = vmul.f32 0.01, %v591_v39  ;;  %v754_v45 = vsel %vm690_vm14, %v588_v27, %v722_v38  ;;  %v652_v9 = vadd.f32 %v2670_v37, %v651_v60 }
  0xfc   : > { %v757_v46 = vsel %vm693_vm15, %v599_v33, %v725_v41  ;;  %vm708_vm8 = vcmp.ge.f32.partialorder %v660_v5, 0.0  ;;  %v740_v14 = vmul.f32 0.01, %v660_v5  ;;  %v787_v17 = vpack.c.bf16 %v2718_v55, %v2690_v21 }
  0xfd   : > { %v2097_v50 = vpop.f32.mrb[12].mxu0  ;;  %v755_v51 = vsel %vm691_vm0, %v591_v39, %v723_v44  ;;  %v783_v52 = vpack.c.bf16 %v757_v46, %v756_v42  ;;  %vm706_vm10 = vcmp.ge.f32.partialorder %v652_v9, 0.0  ;;  %v738_v16 = vmul.f32 0.01, %v652_v9 }
  0xfe   : > { %v612_v56 = vadd.f32 %v2097_v50, %v2670_v37  ;;  %v603_v57 = vpop.f32.mrb[13].mxu0  ;;  %v782_v58 = vpack.c.bf16 %v755_v51, %v754_v45  ;;  %v663_v20 = vadd.f32 %v2110_v1, %v2670_v37  ;;  %v655_v22 = vadd.f32 %v2670_v37, %v654_v6 }
  0xff   : > { %v604_v61 = vadd.f32 %v2670_v37, %v603_v57  ;;  %v2098_v62 = vpop.f32.mrb[14].mxu0  ;;  %v2113_v23 = vpop.f32.mrb[12].mxu1  ;;  %v766_v25 = vsel %vm702_vm1, %v2702_v35, %v734_v47  ;;  %v767_v26 = vsel %vm703_vm4, %v639_v49, %v735_v63  ;;  %v768_v35 = vsel %vm704_vm2, %v2698_v30, %v2706_v43 }
 0x100   : > { %vm696_vm5 = vcmp.ge.f32.partialorder %v612_v56, 0.0  ;;  %v728_v2 = vmul.f32 0.01, %v612_v56  ;;  %v615_v3 = vadd.f32 %v2098_v62, %v2670_v37  ;;  %v606_v4 = vpop.f32.mrb[15].mxu0  ;;  %2175 = vmatprep.mubr.bf16.mxu1 %v782_v58  ;;  %v676_v27 = vadd.f32 %v2113_v23, %v2670_v37  ;;  %v667_v28 = vpop.f32.mrb[13].mxu1 }
 0x101   : > { %vm694_vm6 = vcmp.ge.f32.partialorder %v604_v61, 0.0  ;;  %v726_v7 = vmul.f32 0.01, %v604_v61  ;;  %v607_v8 = vadd.f32 %v2670_v37, %v606_v4  ;;  %2176 = vmatmul.mubr.bf16.gmra.mrb[24].mxu1 %v783_v52  ;;  %vm709_vm11 = vcmp.ge.f32.partialorder %v663_v20, 0.0  ;;  %v2114_v34 = vpop.f32.mrb[14].mxu1 }
 0x102   : > { %vm697_vm7 = vcmp.ge.f32.partialorder %v615_v3, 0.0  ;;  %v729_v10 = vmul.f32 0.01, %v615_v3  ;;  %v760_v11 = vsel %vm696_vm5, %v612_v56, %v728_v2  ;;  %v741_v29 = vmul.f32 0.01, %v663_v20  ;;  %v670_v39 = vpop.f32.mrb[15].mxu1 }
 0x103   : > { %vm695_vm9 = vcmp.ge.f32.partialorder %v607_v8, 0.0  ;;  %v727_v12 = vmul.f32 0.01, %v607_v8  ;;  %v758_v13 = vsel %vm694_vm6, %v604_v61, %v726_v7  ;;  %vm707_vm12 = vcmp.ge.f32.partialorder %v655_v22, 0.0  ;;  %v2761_v56 = vld [vmem:[%s2909_s4] ss:$0 sm:$0xff] }
 0x104   : > { %v761_v15 = vsel %vm697_vm7, %v615_v3, %v729_v10  ;;  %v739_v21 = vmul.f32 0.01, %v655_v22  ;;  %v788_v31 = vpack.c.bf16 %v767_v26, %v766_v25  ;;  %vm712_vm13 = vcmp.ge.f32.partialorder %v676_v27, 0.0 }
 0x105   : > { %v759_v18 = vsel %vm695_vm9, %v607_v8, %v727_v12  ;;  %v785_v19 = vpack.c.bf16 %v761_v15, %v760_v11  ;;  %v744_v32 = vmul.f32 0.01, %v676_v27  ;;  %v668_v33 = vadd.f32 %v2670_v37, %v667_v28 }
 0x106   : > { %v784_v24 = vpack.c.bf16 %v759_v18, %v758_v13  ;;  %v769_v36 = vsel %vm705_vm3, %v2711_v48, %v737_v59  ;;  %v679_v38 = vadd.f32 %v2114_v34, %v2670_v37  ;;  %v770_v40 = vsel %vm706_vm10, %v652_v9, %v738_v16 }
 0x107   : > { %vm710_vm14 = vcmp.ge.f32.partialorder %v668_v33, 0.0  ;;  %v742_v41 = vmul.f32 0.01, %v668_v33  ;;  %v789_v42 = vpack.c.bf16 %v769_v36, %v768_v35  ;;  %v671_v44 = vadd.f32 %v2670_v37, %v670_v39  ;;  %v2396_v37 = vld [vmem:[%s2910_s5 + $0x38] sm:$0xff]  }
 0x108   : > { %2179 = vmatprep.mubr.bf16.mxu1 %v784_v24  ;;  %vm713_vm15 = vcmp.ge.f32.partialorder %v679_v38, 0.0  ;;  %v745_v45 = vmul.f32 0.01, %v679_v38  ;;  %v771_v46 = vsel %vm707_vm12, %v655_v22, %v739_v21  ;;  %v772_v30 = vsel %vm708_vm8, %v660_v5, %v740_v14  ;;  %2249 = vmatprep.subr.bf16.mxu0 %v2396_v37 }
 0x109   : > { %2180 = vmatmul.mubr.bf16.gmra.mrb[28].mxu1 %v785_v19  ;;  %vm711_vm0 = vcmp.ge.f32.partialorder %v671_v44, 0.0  ;;  %v743_v43 = vmul.f32 0.01, %v671_v44  ;;  %v790_v47 = vpack.c.bf16 %v771_v46, %v770_v40  ;;  %v773_v48 = vsel %vm709_vm11, %v663_v20, %v741_v29  ;;  %2250 = vmatpush3.bf16.msra.mxu0 %v2396_v37 }
 0x10a   : > { %2183 = vmatprep.mubr.bf16.mxu1 %v786_v0  ;;  %v791_v49 = vpack.c.bf16 %v773_v48, %v772_v30  ;;  %v774_v50 = vsel %vm710_vm14, %v668_v33, %v742_v41  ;;  %v776_v51 = vsel %vm712_vm13, %v676_v27, %v744_v32  ;;  %v777_v52 = vsel %vm713_vm15, %v679_v38, %v745_v45 }
 0x10b   : > { %v775_v53 = vsel %vm711_vm0, %v671_v44, %v743_v43  ;;  %v793_v54 = vpack.c.bf16 %v777_v52, %v776_v51 }
 0x10c   : > { %v792_v55 = vpack.c.bf16 %v775_v53, %v774_v50 }
 0x111   : > { %2184 = vmatmul.mubr.bf16.gmra.mrb[32].mxu1 %v787_v17 }
 0x112   : > { %2187 = vmatprep.mubr.bf16.mxu1 %v788_v31 }
 0x119   : > { %2188 = vmatmul.mubr.bf16.gmra.mrb[36].mxu1 %v789_v42 }
 0x11a   : > { %2191 = vmatprep.mubr.bf16.mxu1 %v790_v47 }
 0x121   : > { %2192 = vmatmul.mubr.bf16.gmra.mrb[40].mxu1 %v791_v49 }
 0x122   : > { %2195 = vmatprep.mubr.bf16.mxu1 %v792_v55 }
 0x129   : > { %2196 = vmatmul.mubr.bf16.gmra.mrb[44].mxu1 %v793_v54 }
 0x1c4   : > { %v2169_v57 = vpop.f32.mrb[16].mxu1 }
 0x1c5   : > { %v1205_v58 = vadd.f32 %v2169_v57, %v2761_v56  ;;  %v1070_v59 = vpop.f32.mrb[17].mxu1 }
 0x1c6   : > { %v1203_v60 = vadd.f32 %v2761_v56, %v1070_v59  ;;  %v2170_v61 = vpop.f32.mrb[18].mxu1 }
 0x1c7   : > { %v1269_v62 = vmul.f32 0.01, %v1205_v58  ;;  %v1206_v63 = vadd.f32 %v2170_v61, %v2761_v56  ;;  %v1073_v0 = vpop.f32.mrb[19].mxu1  ;;  %vm1237_vm1 = vcmp.ge.f32.partialorder %v1205_v58, 0.0 }
 0x1c8   : > { %v1267_v1 = vmul.f32 0.01, %v1203_v60  ;;  %v1204_v2 = vadd.f32 %v2761_v56, %v1073_v0  ;;  %vm1235_vm2 = vcmp.ge.f32.partialorder %v1203_v60, 0.0 }
 0x1c9   : > { %vm1238_vm3 = vcmp.ge.f32.partialorder %v1206_v63, 0.0  ;;  %v1270_v3 = vmul.f32 0.01, %v1206_v63  ;;  %v1301_v5 = vsel %vm1237_vm1, %v1205_v58, %v1269_v62 }
 0x1ca   : > { %vm1236_vm4 = vcmp.ge.f32.partialorder %v1204_v2, 0.0  ;;  %v1268_v4 = vmul.f32 0.01, %v1204_v2  ;;  %v1299_v9 = vsel %vm1235_vm2, %v1203_v60, %v1267_v1 }
 0x1cb   : > { %v1302_v6 = vsel %vm1238_vm3, %v1206_v63, %v1270_v3 }
 0x1cc   : > { %v1332_v7 = vpack.c.bf16 %v1302_v6, %v1301_v5  ;;  %v2173_v8 = vpop.f32.mrb[20].mxu1  ;;  %v1300_v10 = vsel %vm1236_vm4, %v1204_v2, %v1268_v4 }
 0x1cd   : > { %v1209_v11 = vadd.f32 %v2173_v8, %v2761_v56  ;;  %v1086_v12 = vpop.f32.mrb[21].mxu1  ;;  %v1331_v13 = vpack.c.bf16 %v1300_v10, %v1299_v9 }
 0x1ce   : > { %v1207_v14 = vadd.f32 %v2761_v56, %v1086_v12  ;;  %v2174_v15 = vpop.f32.mrb[22].mxu1 }
 0x1cf   : > { %v1273_v16 = vmul.f32 0.01, %v1209_v11  ;;  %v1210_v17 = vadd.f32 %v2174_v15, %v2761_v56  ;;  %v1089_v18 = vpop.f32.mrb[23].mxu1  ;;  %2251 = vmatprep.mubr.bf16.mxu0 %v1331_v13  ;;  %vm1241_vm5 = vcmp.ge.f32.partialorder %v1209_v11, 0.0 }
 0x1d0   : > { %v1271_v19 = vmul.f32 0.01, %v1207_v14  ;;  %v1208_v20 = vadd.f32 %v2761_v56, %v1089_v18  ;;  %2252 = vmatmul.mubr.bf16.vlgmr.msra.gmra.mrb[16].mxu0 %v1332_v7  ;;  %vm1239_vm6 = vcmp.ge.f32.partialorder %v1207_v14, 0.0 }
 0x1d1   : > { %vm1242_vm7 = vcmp.ge.f32.partialorder %v1210_v17, 0.0  ;;  %v1274_v22 = vmul.f32 0.01, %v1210_v17  ;;  %v1305_v24 = vsel %vm1241_vm5, %v1209_v11, %v1273_v16 }
 0x1d2   : > { %vm1240_vm8 = vcmp.ge.f32.partialorder %v1208_v20, 0.0  ;;  %v1272_v23 = vmul.f32 0.01, %v1208_v20  ;;  %v1303_v27 = vsel %vm1239_vm6, %v1207_v14, %v1271_v19 }
 0x1d3   : > { %v1306_v25 = vsel %vm1242_vm7, %v1210_v17, %v1274_v22 }
 0x1d4   : > { %v2177_v26 = vpop.f32.mrb[24].mxu1  ;;  %v1304_v28 = vsel %vm1240_vm8, %v1208_v20, %v1272_v23  ;;  %v1334_v29 = vpack.c.bf16 %v1306_v25, %v1305_v24 }
 0x1d5   : > { %v1213_v21 = vadd.f32 %v2177_v26, %v2761_v56  ;;  %v1102_v31 = vpop.f32.mrb[25].mxu1  ;;  %v1333_v32 = vpack.c.bf16 %v1304_v28, %v1303_v27 }
 0x1d6   : > { %v1211_v33 = vadd.f32 %v2761_v56, %v1102_v31  ;;  %v2178_v34 = vpop.f32.mrb[26].mxu1 }
 0x1d7   : > { %v1277_v35 = vmul.f32 0.01, %v1213_v21  ;;  %v1214_v36 = vadd.f32 %v2178_v34, %v2761_v56  ;;  %v1105_v38 = vpop.f32.mrb[27].mxu1  ;;  %2255 = vmatprep.mubr.bf16.mxu0 %v1333_v32  ;;  %vm1245_vm9 = vcmp.ge.f32.partialorder %v1213_v21, 0.0 }
 0x1d8   : > { %v1275_v39 = vmul.f32 0.01, %v1211_v33  ;;  %v1212_v40 = vadd.f32 %v2761_v56, %v1105_v38  ;;  %2256 = vmatmul.mubr.bf16.gmra.mrb[20].mxu0 %v1334_v29  ;;  %vm1243_vm10 = vcmp.ge.f32.partialorder %v1211_v33, 0.0 }
 0x1d9   : > { %vm1246_vm11 = vcmp.ge.f32.partialorder %v1214_v36, 0.0  ;;  %v1278_v41 = vmul.f32 0.01, %v1214_v36  ;;  %v1309_v44 = vsel %vm1245_vm9, %v1213_v21, %v1277_v35 }
 0x1da   : > { %vm1244_vm12 = vcmp.ge.f32.partialorder %v1212_v40, 0.0  ;;  %v1276_v42 = vmul.f32 0.01, %v1212_v40  ;;  %v1307_v30 = vsel %vm1243_vm10, %v1211_v33, %v1275_v39 }
 0x1db   : > { %v1310_v45 = vsel %vm1246_vm11, %v1214_v36, %v1278_v41 }
 0x1dc   : > { %v2181_v46 = vpop.f32.mrb[28].mxu1  ;;  %v1308_v43 = vsel %vm1244_vm12, %v1212_v40, %v1276_v42  ;;  %v1336_v47 = vpack.c.bf16 %v1310_v45, %v1309_v44 }
 0x1dd   : > { %v1217_v48 = vadd.f32 %v2181_v46, %v2761_v56  ;;  %v1118_v49 = vpop.f32.mrb[29].mxu1  ;;  %v1335_v50 = vpack.c.bf16 %v1308_v43, %v1307_v30 }
 0x1de   : > { %v1215_v51 = vadd.f32 %v2761_v56, %v1118_v49  ;;  %v2182_v52 = vpop.f32.mrb[30].mxu1 }
 0x1df   : > { %v1281_v53 = vmul.f32 0.01, %v1217_v48  ;;  %v1218_v54 = vadd.f32 %v2182_v52, %v2761_v56  ;;  %v1121_v55 = vpop.f32.mrb[31].mxu1  ;;  %2259 = vmatprep.mubr.bf16.mxu0 %v1335_v50  ;;  %vm1249_vm13 = vcmp.ge.f32.partialorder %v1217_v48, 0.0 }
 0x1e0   : > { %v1279_v37 = vmul.f32 0.01, %v1215_v51  ;;  %v1216_v57 = vadd.f32 %v2761_v56, %v1121_v55  ;;  %2260 = vmatmul.mubr.bf16.gmra.mrb[24].mxu0 %v1336_v47  ;;  %vm1247_vm14 = vcmp.ge.f32.partialorder %v1215_v51, 0.0 }
 0x1e1   : > { %vm1250_vm15 = vcmp.ge.f32.partialorder %v1218_v54, 0.0  ;;  %v1282_v58 = vmul.f32 0.01, %v1218_v54  ;;  %v1313_v60 = vsel %vm1249_vm13, %v1217_v48, %v1281_v53 }
 0x1e2   : > { %vm1248_vm0 = vcmp.ge.f32.partialorder %v1216_v57, 0.0  ;;  %v1280_v59 = vmul.f32 0.01, %v1216_v57  ;;  %v1311_v63 = vsel %vm1247_vm14, %v1215_v51, %v1279_v37 }
 0x1e3   : > { %v1314_v61 = vsel %vm1250_vm15, %v1218_v54, %v1282_v58 }
 0x1e4   : > { %v2185_v62 = vpop.f32.mrb[32].mxu1  ;;  %v1312_v0 = vsel %vm1248_vm0, %v1216_v57, %v1280_v59  ;;  %v1338_v1 = vpack.c.bf16 %v1314_v61, %v1313_v60 }
 0x1e5   : > { %v1221_v2 = vadd.f32 %v2185_v62, %v2761_v56  ;;  %v1134_v3 = vpop.f32.mrb[33].mxu1  ;;  %v1337_v4 = vpack.c.bf16 %v1312_v0, %v1311_v63 }
 0x1e6   : > { %v1219_v5 = vadd.f32 %v2761_v56, %v1134_v3  ;;  %v2186_v6 = vpop.f32.mrb[34].mxu1 }
 0x1e7   : > { %v1285_v7 = vmul.f32 0.01, %v1221_v2  ;;  %v1222_v8 = vadd.f32 %v2186_v6, %v2761_v56  ;;  %v1137_v9 = vpop.f32.mrb[35].mxu1  ;;  %2263 = vmatprep.mubr.bf16.mxu0 %v1337_v4  ;;  %vm1253_vm1 = vcmp.ge.f32.partialorder %v1221_v2, 0.0 }
 0x1e8   : > { %v1283_v10 = vmul.f32 0.01, %v1219_v5  ;;  %v1220_v11 = vadd.f32 %v2761_v56, %v1137_v9  ;;  %2264 = vmatmul.mubr.bf16.gmra.mrb[28].mxu0 %v1338_v1  ;;  %vm1251_vm2 = vcmp.ge.f32.partialorder %v1219_v5, 0.0 }
 0x1e9   : > { %vm1254_vm3 = vcmp.ge.f32.partialorder %v1222_v8, 0.0  ;;  %v1286_v12 = vmul.f32 0.01, %v1222_v8  ;;  %v1317_v14 = vsel %vm1253_vm1, %v1221_v2, %v1285_v7  ;;  %vm1788_vm1 = vcmask 130048  }
 0x1ea   : > { %vm1252_vm4 = vcmp.ge.f32.partialorder %v1220_v11, 0.0  ;;  %v1284_v13 = vmul.f32 0.01, %v1220_v11  ;;  %v1315_v17 = vsel %vm1251_vm2, %v1219_v5, %v1283_v10 }
 0x1eb   : > { %v1318_v15 = vsel %vm1254_vm3, %v1222_v8, %v1286_v12 }
 0x1ec   : > { %v2189_v16 = vpop.f32.mrb[36].mxu1  ;;  %v1316_v18 = vsel %vm1252_vm4, %v1220_v11, %v1284_v13  ;;  %v1340_v19 = vpack.c.bf16 %v1318_v15, %v1317_v14  ;;  %v2799_v11 = vld [vmem:[%s2911_s6] ss:$0 sm:$0xff] }
 0x1ed   : > { %v1225_v20 = vadd.f32 %v2189_v16, %v2761_v56  ;;  %v1150_v22 = vpop.f32.mrb[37].mxu1  ;;  %v1339_v23 = vpack.c.bf16 %v1316_v18, %v1315_v17 }
 0x1ee   : > { %v1223_v24 = vadd.f32 %v2761_v56, %v1150_v22  ;;  %v2190_v25 = vpop.f32.mrb[38].mxu1 }
 0x1ef   : > { %v1289_v26 = vmul.f32 0.01, %v1225_v20  ;;  %v1226_v27 = vadd.f32 %v2190_v25, %v2761_v56  ;;  %v1153_v28 = vpop.f32.mrb[39].mxu1  ;;  %2267 = vmatprep.mubr.bf16.mxu0 %v1339_v23  ;;  %vm1257_vm5 = vcmp.ge.f32.partialorder %v1225_v20, 0.0 }
 0x1f0   : > { %v1287_v29 = vmul.f32 0.01, %v1223_v24  ;;  %v1224_v21 = vadd.f32 %v2761_v56, %v1153_v28  ;;  %2268 = vmatmul.mubr.bf16.gmra.mrb[32].mxu0 %v1340_v19  ;;  %vm1255_vm6 = vcmp.ge.f32.partialorder %v1223_v24, 0.0 }
 0x1f1   : > { %vm1258_vm7 = vcmp.ge.f32.partialorder %v1226_v27, 0.0  ;;  %v1290_v31 = vmul.f32 0.01, %v1226_v27  ;;  %v1321_v33 = vsel %vm1257_vm5, %v1225_v20, %v1289_v26 }
 0x1f2   : > { %vm1256_vm8 = vcmp.ge.f32.partialorder %v1224_v21, 0.0  ;;  %v1288_v32 = vmul.f32 0.01, %v1224_v21  ;;  %v1319_v36 = vsel %vm1255_vm6, %v1223_v24, %v1287_v29 }
 0x1f3   : > { %v1322_v34 = vsel %vm1258_vm7, %v1226_v27, %v1290_v31 }
 0x1f4   : > { %v2193_v35 = vpop.f32.mrb[40].mxu1  ;;  %v1320_v38 = vsel %vm1256_vm8, %v1224_v21, %v1288_v32  ;;  %v1342_v39 = vpack.c.bf16 %v1322_v34, %v1321_v33 }
 0x1f5   : > { %v1229_v40 = vadd.f32 %v2193_v35, %v2761_v56  ;;  %v1166_v41 = vpop.f32.mrb[41].mxu1  ;;  %v1341_v42 = vpack.c.bf16 %v1320_v38, %v1319_v36 }
 0x1f6   : > { %v1227_v44 = vadd.f32 %v2761_v56, %v1166_v41  ;;  %v2194_v45 = vpop.f32.mrb[42].mxu1 }
 0x1f7   : > { %v1293_v46 = vmul.f32 0.01, %v1229_v40  ;;  %v1230_v30 = vadd.f32 %v2194_v45, %v2761_v56  ;;  %v1169_v43 = vpop.f32.mrb[43].mxu1  ;;  %2271 = vmatprep.mubr.bf16.mxu0 %v1341_v42  ;;  %vm1261_vm9 = vcmp.ge.f32.partialorder %v1229_v40, 0.0 }
 0x1f8   : > { %v1291_v47 = vmul.f32 0.01, %v1227_v44  ;;  %v1228_v48 = vadd.f32 %v2761_v56, %v1169_v43  ;;  %2272 = vmatmul.mubr.bf16.gmra.mrb[36].mxu0 %v1342_v39  ;;  %vm1259_vm10 = vcmp.ge.f32.partialorder %v1227_v44, 0.0 }
 0x1f9   : > { %vm1262_vm11 = vcmp.ge.f32.partialorder %v1230_v30, 0.0  ;;  %v1294_v49 = vmul.f32 0.01, %v1230_v30  ;;  %v1325_v51 = vsel %vm1261_vm9, %v1229_v40, %v1293_v46 }
 0x1fa   : > { %vm1260_vm12 = vcmp.ge.f32.partialorder %v1228_v48, 0.0  ;;  %v1292_v50 = vmul.f32 0.01, %v1228_v48  ;;  %v1323_v54 = vsel %vm1259_vm10, %v1227_v44, %v1291_v47 }
 0x1fb   : > { %v1326_v52 = vsel %vm1262_vm11, %v1230_v30, %v1294_v49 }
 0x1fc   : > { %v2197_v53 = vpop.f32.mrb[44].mxu1  ;;  %v1324_v55 = vsel %vm1260_vm12, %v1228_v48, %v1292_v50  ;;  %v1344_v37 = vpack.c.bf16 %v1326_v52, %v1325_v51 }
 0x1fd   : > { %v1233_v57 = vadd.f32 %v2197_v53, %v2761_v56  ;;  %v1182_v58 = vpop.f32.mrb[45].mxu1  ;;  %v1343_v59 = vpack.c.bf16 %v1324_v55, %v1323_v54 }
 0x1fe   : > { %v1231_v60 = vadd.f32 %v2761_v56, %v1182_v58  ;;  %v2198_v61 = vpop.f32.mrb[46].mxu1 }
 0x1ff   : > { %v1297_v62 = vmul.f32 0.01, %v1233_v57  ;;  %v1234_v63 = vadd.f32 %v2198_v61, %v2761_v56  ;;  %v1185_v0 = vpop.f32.mrb[47].mxu1  ;;  %2275 = vmatprep.mubr.bf16.mxu0 %v1343_v59  ;;  %vm1265_vm13 = vcmp.ge.f32.partialorder %v1233_v57, 0.0 }
 0x200   : > { %v1295_v1 = vmul.f32 0.01, %v1231_v60  ;;  %v1232_v2 = vadd.f32 %v2761_v56, %v1185_v0  ;;  %2276 = vmatmul.mubr.bf16.gmra.mrb[40].mxu0 %v1344_v37  ;;  %vm1263_vm14 = vcmp.ge.f32.partialorder %v1231_v60, 0.0 }
 0x201   : > { %vm1266_vm15 = vcmp.ge.f32.partialorder %v1234_v63, 0.0  ;;  %v1298_v3 = vmul.f32 0.01, %v1234_v63  ;;  %v1329_v5 = vsel %vm1265_vm13, %v1233_v57, %v1297_v62 }
 0x202   : > { %vm1264_vm0 = vcmp.ge.f32.partialorder %v1232_v2, 0.0  ;;  %v1296_v4 = vmul.f32 0.01, %v1232_v2  ;;  %v1327_v7 = vsel %vm1263_vm14, %v1231_v60, %v1295_v1 }
 0x203   : > { %v1330_v6 = vsel %vm1266_vm15, %v1234_v63, %v1298_v3 }
 0x204   : > { %v1328_v8 = vsel %vm1264_vm0, %v1232_v2, %v1296_v4  ;;  %v1346_v9 = vpack.c.bf16 %v1330_v6, %v1329_v5 }
 0x205   : > { %v1345_v10 = vpack.c.bf16 %v1328_v8, %v1327_v7 }
 0x207   : > { %2279 = vmatprep.mubr.bf16.mxu0 %v1345_v10 }
 0x208   : > { %2280 = vmatmul.mubr.bf16.gmra.mrb[44].mxu0 %v1346_v9 }
 0x2a3   : > { %v2253_v56 = vpop.f32.mrb[16].mxu0 }
 0x2a4   : > { %v1758_v12 = vadd.f32 %v2253_v56, %v2799_v11  ;;  %v1623_v13 = vpop.f32.mrb[17].mxu0 }
 0x2a5   : > { %v1756_v14 = vadd.f32 %v2799_v11, %v1623_v13  ;;  %v2254_v15 = vpop.f32.mrb[18].mxu0 }
 0x2a6   : > { %1791 = vst.msk [vmem:[%s2804_s11 + $0x10] sm:$0xff] %vm1788_vm1, %v1758_v12  ;;  %v1759_v16 = vadd.f32 %v2254_v15, %v2799_v11  ;;  %v1626_v17 = vpop.f32.mrb[19].mxu0 }
 0x2a7   : > { %1789 = vst.msk [vmem:[%s2804_s11] sm:$0xff] %vm1788_vm1, %v1756_v14  ;;  %v1757_v18 = vadd.f32 %v2799_v11, %v1626_v17 }
 0x2a8   : > { %1792 = vst.msk [vmem:[%s2804_s11 + $0x18] sm:$0xff] %vm1788_vm1, %v1759_v16 }
 0x2a9   : > { %1790 = vst.msk [vmem:[%s2804_s11 + $0x8] sm:$0xff] %vm1788_vm1, %v1757_v18 }
 0x2ab   : > { %v2257_v19 = vpop.f32.mrb[20].mxu0 }
 0x2ac   : > { %v1762_v20 = vadd.f32 %v2257_v19, %v2799_v11  ;;  %v1639_v22 = vpop.f32.mrb[21].mxu0 }
 0x2ad   : > { %v1760_v23 = vadd.f32 %v2799_v11, %v1639_v22  ;;  %v2258_v24 = vpop.f32.mrb[22].mxu0 }
 0x2ae   : > { %1795 = vst.msk [vmem:[%s2804_s11 + $0x30] sm:$0xff] %vm1788_vm1, %v1762_v20  ;;  %v1763_v25 = vadd.f32 %v2258_v24, %v2799_v11  ;;  %v1642_v26 = vpop.f32.mrb[23].mxu0 }
 0x2af   : > { %1793 = vst.msk [vmem:[%s2804_s11 + $0x20] sm:$0xff] %vm1788_vm1, %v1760_v23  ;;  %v1761_v27 = vadd.f32 %v2799_v11, %v1642_v26 }
 0x2b0   : > { %1796 = vst.msk [vmem:[%s2804_s11 + $0x38] sm:$0xff] %vm1788_vm1, %v1763_v25 }
 0x2b1   : > { %1794 = vst.msk [vmem:[%s2804_s11 + $0x28] sm:$0xff] %vm1788_vm1, %v1761_v27 }
 0x2b3   : > { %v2261_v28 = vpop.f32.mrb[24].mxu0 }
 0x2b4   : > { %v1766_v29 = vadd.f32 %v2261_v28, %v2799_v11  ;;  %v1655_v21 = vpop.f32.mrb[25].mxu0 }
 0x2b5   : > { %v1764_v31 = vadd.f32 %v2799_v11, %v1655_v21  ;;  %v2262_v32 = vpop.f32.mrb[26].mxu0 }
 0x2b6   : > { %1799 = vst.msk [vmem:[%s2804_s11 + $0x50] sm:$0xff] %vm1788_vm1, %v1766_v29  ;;  %v1767_v33 = vadd.f32 %v2262_v32, %v2799_v11  ;;  %v1658_v34 = vpop.f32.mrb[27].mxu0 }
 0x2b7   : > { %1797 = vst.msk [vmem:[%s2804_s11 + $0x40] sm:$0xff] %vm1788_vm1, %v1764_v31  ;;  %v1765_v35 = vadd.f32 %v2799_v11, %v1658_v34 }
 0x2b8   : > { %1800 = vst.msk [vmem:[%s2804_s11 + $0x58] sm:$0xff] %vm1788_vm1, %v1767_v33 }
 0x2b9   : > { %1798 = vst.msk [vmem:[%s2804_s11 + $0x48] sm:$0xff] %vm1788_vm1, %v1765_v35 }
 0x2bb   : > { %v2265_v36 = vpop.f32.mrb[28].mxu0 }
 0x2bc   : > { %v1770_v38 = vadd.f32 %v2265_v36, %v2799_v11  ;;  %v1671_v39 = vpop.f32.mrb[29].mxu0 }
 0x2bd   : > { %v1768_v40 = vadd.f32 %v2799_v11, %v1671_v39  ;;  %v2266_v41 = vpop.f32.mrb[30].mxu0 }
 0x2be   : > { %1803 = vst.msk [vmem:[%s2804_s11 + $0x70] sm:$0xff] %vm1788_vm1, %v1770_v38  ;;  %v1771_v42 = vadd.f32 %v2266_v41, %v2799_v11  ;;  %v1674_v44 = vpop.f32.mrb[31].mxu0 }
 0x2bf   : > { %1801 = vst.msk [vmem:[%s2804_s11 + $0x60] sm:$0xff] %vm1788_vm1, %v1768_v40  ;;  %v1769_v45 = vadd.f32 %v2799_v11, %v1674_v44 }
 0x2c0   : > { %1804 = vst.msk [vmem:[%s2804_s11 + $0x78] sm:$0xff] %vm1788_vm1, %v1771_v42 }
 0x2c1   : > { %1802 = vst.msk [vmem:[%s2804_s11 + $0x68] sm:$0xff] %vm1788_vm1, %v1769_v45 }
 0x2c3   : > { %v2269_v46 = vpop.f32.mrb[32].mxu0 }
 0x2c4   : > { %v1774_v30 = vadd.f32 %v2269_v46, %v2799_v11  ;;  %v1687_v43 = vpop.f32.mrb[33].mxu0 }
 0x2c5   : > { %v1772_v47 = vadd.f32 %v2799_v11, %v1687_v43  ;;  %v2270_v48 = vpop.f32.mrb[34].mxu0 }
 0x2c6   : > { %1807 = vst.msk [vmem:[%s2804_s11 + $0x90] sm:$0xff] %vm1788_vm1, %v1774_v30  ;;  %v1775_v49 = vadd.f32 %v2270_v48, %v2799_v11  ;;  %v1690_v50 = vpop.f32.mrb[35].mxu0 }
 0x2c7   : > { %1805 = vst.msk [vmem:[%s2804_s11 + $0x80] sm:$0xff] %vm1788_vm1, %v1772_v47  ;;  %v1773_v51 = vadd.f32 %v2799_v11, %v1690_v50 }
 0x2c8   : > { %1808 = vst.msk [vmem:[%s2804_s11 + $0x98] sm:$0xff] %vm1788_vm1, %v1775_v49 }
 0x2c9   : > { %1806 = vst.msk [vmem:[%s2804_s11 + $0x88] sm:$0xff] %vm1788_vm1, %v1773_v51 }
 0x2cb   : > { %v2273_v52 = vpop.f32.mrb[36].mxu0 }
 0x2cc   : > { %v1778_v53 = vadd.f32 %v2273_v52, %v2799_v11  ;;  %v1703_v54 = vpop.f32.mrb[37].mxu0 }
 0x2cd   : > { %v1776_v55 = vadd.f32 %v2799_v11, %v1703_v54  ;;  %v2274_v37 = vpop.f32.mrb[38].mxu0 }
 0x2ce   : > { %1811 = vst.msk [vmem:[%s2804_s11 + $0xb0] sm:$0xff] %vm1788_vm1, %v1778_v53  ;;  %v1779_v57 = vadd.f32 %v2274_v37, %v2799_v11  ;;  %v1706_v58 = vpop.f32.mrb[39].mxu0 }
 0x2cf   : > { %1809 = vst.msk [vmem:[%s2804_s11 + $0xa0] sm:$0xff] %vm1788_vm1, %v1776_v55  ;;  %v1777_v59 = vadd.f32 %v2799_v11, %v1706_v58 }
 0x2d0   : > { %1812 = vst.msk [vmem:[%s2804_s11 + $0xb8] sm:$0xff] %vm1788_vm1, %v1779_v57 }
 0x2d1   : > { %1810 = vst.msk [vmem:[%s2804_s11 + $0xa8] sm:$0xff] %vm1788_vm1, %v1777_v59 }
 0x2d3   : > { %v2277_v60 = vpop.f32.mrb[40].mxu0 }
 0x2d4   : > { %v1782_v61 = vadd.f32 %v2277_v60, %v2799_v11  ;;  %v1719_v62 = vpop.f32.mrb[41].mxu0 }
 0x2d5   : > { %v1780_v63 = vadd.f32 %v2799_v11, %v1719_v62  ;;  %v2278_v0 = vpop.f32.mrb[42].mxu0 }
 0x2d6   : > { %1815 = vst.msk [vmem:[%s2804_s11 + $0xd0] sm:$0xff] %vm1788_vm1, %v1782_v61  ;;  %v1783_v1 = vadd.f32 %v2278_v0, %v2799_v11  ;;  %v1722_v2 = vpop.f32.mrb[43].mxu0 }
 0x2d7   : > { %1813 = vst.msk [vmem:[%s2804_s11 + $0xc0] sm:$0xff] %vm1788_vm1, %v1780_v63  ;;  %v1781_v3 = vadd.f32 %v2799_v11, %v1722_v2 }
 0x2d8   : > { %1816 = vst.msk [vmem:[%s2804_s11 + $0xd8] sm:$0xff] %vm1788_vm1, %v1783_v1 }
 0x2d9   : > { %1814 = vst.msk [vmem:[%s2804_s11 + $0xc8] sm:$0xff] %vm1788_vm1, %v1781_v3 }
 0x2db   : > { %v2281_v4 = vpop.f32.mrb[44].mxu0 }
 0x2dc   : > { %v1786_v5 = vadd.f32 %v2281_v4, %v2799_v11  ;;  %v1735_v6 = vpop.f32.mrb[45].mxu0 }
 0x2dd   : > { %v1784_v7 = vadd.f32 %v2799_v11, %v1735_v6  ;;  %v2282_v8 = vpop.f32.mrb[46].mxu0 }
 0x2de   : > { %1819 = vst.msk [vmem:[%s2804_s11 + $0xf0] sm:$0xff] %vm1788_vm1, %v1786_v5  ;;  %v1787_v9 = vadd.f32 %v2282_v8, %v2799_v11  ;;  %v1738_v10 = vpop.f32.mrb[47].mxu0 }
 0x2df   : > { %1817 = vst.msk [vmem:[%s2804_s11 + $0xe0] sm:$0xff] %vm1788_vm1, %v1784_v7  ;;  %v1785_v56 = vadd.f32 %v2799_v11, %v1738_v10 }
 0x2e0   : > { %1820 = vst.msk [vmem:[%s2804_s11 + $0xf8] sm:$0xff] %vm1788_vm1, %v1787_v9 }
 0x2e1   : > { %1818 = vst.msk [vmem:[%s2804_s11 + $0xe8] sm:$0xff] %vm1788_vm1, %v1785_v56 }
 0x2e2 PF: > { %s19_s30 = sadd.s32 1, %s2403_s30  }
 0x2e3   : > { %p16_p4 = scmp.ge.s32.totalorder %s19_s30, 4  }
 0x2e5   :  { %18 = sbr.rel (!%p16_p4) target bundleno = 1 (0x1), region = 86 }

</bundles_post_ra>
